<compile_context>
chip_gen: v6e
topology: v6e:2x2x1
jax: 0.10.0
libtpu: 0.0.40
codegen_flags: <defaults>
</compile_context>

<pallas_src>
import jax
import jax.numpy as jnp
from jax.experimental import pallas as pl
from jax.experimental.pallas import tpu as pltpu

HIDDEN = 256  # fc1/fc2/fc3 output width (output_dim is unused in the original module)


def _round_up(x, m):
    return ((x + m - 1) // m) * m


def mlp_logsoftmax_kernel(x_ref, w1_ref, b1_ref, w2_ref, b2_ref, w3_ref, b3_ref,
                          o_ref):
    # Cast x inside the kernel (VPU cast is free filler; avoids a wrapper-side
    # read-f32/write-bf16 pass over x in HBM).
    x = x_ref[...].astype(w1_ref.dtype)
    # fc1 + ReLU  (bf16 MXU operands, f32 accumulation)
    h = jnp.dot(x, w1_ref[...], preferred_element_type=jnp.float32) + b1_ref[...]
    h = jnp.maximum(h, 0.0)
    # fc2 + ReLU
    h = jnp.dot(h.astype(w2_ref.dtype), w2_ref[...],
                preferred_element_type=jnp.float32) + b2_ref[...]
    h = jnp.maximum(h, 0.0)
    # fc3
    logits = jnp.dot(h.astype(w3_ref.dtype), w3_ref[...],
                     preferred_element_type=jnp.float32) + b3_ref[...]
    # LogSoftmax along the feature axis (dim=1 in PyTorch), max-shifted, in f32.
    m = jnp.max(logits, axis=-1, keepdims=True)
    shifted = logits - m
    lse = jnp.log(jnp.sum(jnp.exp(shifted), axis=-1, keepdims=True))
    o_ref[...] = (shifted - lse).astype(o_ref.dtype)


def prepare_params(params, *, use_bf16=True):
    """One-time dtype conversion (do NOT call per forward pass)."""
    w1, b1, w2, b2, w3, b3 = params
    mm_dtype = jnp.bfloat16 if use_bf16 else jnp.float32
    f32 = jnp.float32
    return (w1.astype(mm_dtype), b1.astype(f32).reshape(1, HIDDEN),
            w2.astype(mm_dtype), b2.astype(f32).reshape(1, HIDDEN),
            w3.astype(mm_dtype), b3.astype(f32).reshape(1, HIDDEN))


def classification_model_forward(x, prepared_params, *, out_dtype=jnp.float32):
    """x: (B, input_dim) float32. Returns (B, 256) log-probabilities."""
    w1, b1, w2, b2, w3, b3 = prepared_params
    B, input_dim = x.shape
    assert w1.shape == (input_dim, HIDDEN)

    mm_itemsize = jnp.dtype(w1.dtype).itemsize
    out_itemsize = jnp.dtype(out_dtype).itemsize
    weight_bytes = (input_dim * HIDDEN + 2 * HIDDEN * HIDDEN) * mm_itemsize \
        + 3 * HIDDEN * 4

    # ---- adaptive batch tile: multiple of 8 sublanes, capped at 128 ----
    # (128 = full 128x128 MXU pass on v5e, and >=2 "parallel" grid steps on
    #  v7x's two TensorCores whenever the batch spans more than one tile.)
    batch_tile = min(128, _round_up(max(B, 1), 8))

    # Shrink the tile if x (f32, double-buffered) + resident weights + output
    # tile would exceed a conservative scoped-VMEM budget.
    def _vmem_need(bt):
        return (2 * bt * input_dim * 4            # x tile, f32, double-buffered
                + weight_bytes                    # single-buffered weights/biases
                + 2 * bt * HIDDEN * out_itemsize) # output tile, double-buffered
    while batch_tile > 8 and _vmem_need(batch_tile) > (40 << 20):
        batch_tile = max(8, batch_tile // 2)

    # ---- pad batch only if needed (padded rows stay finite: bias-only rows) ----
    b_pad = _round_up(max(B, 1), batch_tile)
    if b_pad != B:
        x = jnp.pad(x, ((0, b_pad - B), (0, 0)))

    grid = (b_pad // batch_tile,)
    full = lambda i: (0, 0)          # weights/biases: constant block index
    resident = pl.Buffered(1)        # block never changes -> single buffer

    flops = 2 * b_pad * (input_dim * HIDDEN + 2 * HIDDEN * HIDDEN)
    bytes_accessed = (b_pad * input_dim * 4          # x (f32, read in-kernel)
                      + weight_bytes                 # w1,w2,w3,b1,b2,b3
                      + b_pad * HIDDEN * out_itemsize)  # output
    cost = pl.CostEstimate(flops=flops,
                           transcendentals=b_pad * (HIDDEN + 1),
                           bytes_accessed=bytes_accessed)

    vmem_limit = int(min(max(2 * _vmem_need(batch_tile), 32 << 20), 64 << 20))

    out = pl.pallas_call(
        mlp_logsoftmax_kernel,
        out_shape=jax.ShapeDtypeStruct((b_pad, HIDDEN), out_dtype),
        grid_spec=pl.GridSpec(
            grid=grid,
            in_specs=[
                pl.BlockSpec((batch_tile, input_dim), lambda i: (i, 0)),  # x
                pl.BlockSpec((input_dim, HIDDEN), full, pipeline_mode=resident),
                pl.BlockSpec((1, HIDDEN), full, pipeline_mode=resident),
                pl.BlockSpec((HIDDEN, HIDDEN), full, pipeline_mode=resident),
                pl.BlockSpec((1, HIDDEN), full, pipeline_mode=resident),
                pl.BlockSpec((HIDDEN, HIDDEN), full, pipeline_mode=resident),
                pl.BlockSpec((1, HIDDEN), full, pipeline_mode=resident),
            ],
            out_specs=pl.BlockSpec((batch_tile, HIDDEN), lambda i: (i, 0)),
        ),
        compiler_params=pltpu.CompilerParams(
            dimension_semantics=("parallel",),
            vmem_limit_bytes=vmem_limit),
        cost_estimate=cost,
    )(x, w1, b1, w2, b2, w3, b3)

    return out if b_pad == B else out[:B]


def init_params(key, input_dim):
    """PyTorch-style (uniform +/- 1/sqrt(fan_in)) init.
    Weights stored as (in, out); biases as (1, out) for 2-D VMEM tiles."""
    k1, k2, k3, k4, k5, k6 = jax.random.split(key, 6)

    def lin(kw, kb, fan_in, fan_out):
        bound = 1.0 / jnp.sqrt(fan_in)
        w = jax.random.uniform(kw, (fan_in, fan_out), jnp.float32, -bound, bound)
        b = jax.random.uniform(kb, (1, fan_out), jnp.float32, -bound, bound)
        return w, b

    w1, b1 = lin(k1, k2, input_dim, HIDDEN)
    w2, b2 = lin(k3, k4, HIDDEN, HIDDEN)
    w3, b3 = lin(k5, k6, HIDDEN, HIDDEN)
    return (w1, b1, w2, b2, w3, b3)


def reference_forward(x, params):
    w1, b1, w2, b2, w3, b3 = params
    h = jnp.maximum(x @ w1 + b1, 0.0)
    h = jnp.maximum(h @ w2 + b2, 0.0)
    logits = h @ w3 + b3
    return jax.nn.log_softmax(logits, axis=1)


if __name__ == "__main__":
    key = jax.random.PRNGKey(0)
    kx, kp, kx2 = jax.random.split(key, 3)

    batch = 8
    input_dim = 32  # stand-in for X_train.shape[1]

    x = jax.random.normal(kx, (batch, input_dim), dtype=jnp.float32)
    params = init_params(kp, input_dim)
    ref = reference_forward(x, params)

    # Exact f32 path: must match the reference tightly.
    p_f32 = prepare_params(params, use_bf16=False)
    out_f32 = classification_model_forward(x, p_f32)
    out_f32 = jax.block_until_ready(out_f32)
    assert out_f32.shape == (batch, HIDDEN)
    assert jnp.allclose(out_f32, ref, atol=1e-4, rtol=1e-4), "f32 mismatch"

    # Default fast path: bf16 matmul operands, f32 accumulation / elementwise.
    p_bf16 = prepare_params(params, use_bf16=True)
    out_bf16 = classification_model_forward(x, p_bf16)
    out_bf16 = jax.block_until_ready(out_bf16)
    assert out_bf16.shape == (batch, HIDDEN)
    assert jnp.all(jnp.isfinite(out_bf16))
    assert jnp.allclose(out_bf16, ref, atol=2e-2, rtol=2e-2), "bf16 mismatch"

    # Non-multiple batch exercises the zero-pad + final-slice path.
    x2 = jax.random.normal(kx2, (13, input_dim), dtype=jnp.float32)
    ref2 = reference_forward(x2, params)
    out2 = jax.block_until_ready(classification_model_forward(x2, p_bf16))
    assert out2.shape == (13, HIDDEN)
    assert jnp.allclose(out2, ref2, atol=2e-2, rtol=2e-2), "padded-batch mismatch"

    print("KERNEL_OK")
</pallas_src>

<mosaic_0001>
module attributes {stable_mosaic.version = 11 : i64} {
  func.func @mlp_logsoftmax_kernel(%arg0: i32, %arg1: memref<8x32xf32, #tpu.memory_space<vmem>>, %arg2: memref<32x256xf32, #tpu.memory_space<vmem>>, %arg3: memref<1x256xf32, #tpu.memory_space<vmem>>, %arg4: memref<256x256xf32, #tpu.memory_space<vmem>>, %arg5: memref<1x256xf32, #tpu.memory_space<vmem>>, %arg6: memref<256x256xf32, #tpu.memory_space<vmem>>, %arg7: memref<1x256xf32, #tpu.memory_space<vmem>>, %arg8: memref<8x256xf32, #tpu.memory_space<vmem>>) attributes {dimension_semantics = [#tpu.dimension_semantics<parallel>], iteration_bounds = array<i64: 1>, scalar_prefetch = 0 : i64, scratch_operands = 0 : i64, tpu.core_type = #tpu.core_type<tc>, window_params = [{transform_indices = @transform_0, window_bounds = array<i64: 8, 32>}, {pipeline_mode = #tpu.pipeline_mode<synchronous>, transform_indices = @transform_1, window_bounds = array<i64: 32, 256>}, {pipeline_mode = #tpu.pipeline_mode<synchronous>, transform_indices = @transform_2, window_bounds = array<i64: 1, 256>}, {pipeline_mode = #tpu.pipeline_mode<synchronous>, transform_indices = @transform_3, window_bounds = array<i64: 256, 256>}, {pipeline_mode = #tpu.pipeline_mode<synchronous>, transform_indices = @transform_4, window_bounds = array<i64: 1, 256>}, {pipeline_mode = #tpu.pipeline_mode<synchronous>, transform_indices = @transform_5, window_bounds = array<i64: 256, 256>}, {pipeline_mode = #tpu.pipeline_mode<synchronous>, transform_indices = @transform_6, window_bounds = array<i64: 1, 256>}, {transform_indices = @transform_7, window_bounds = array<i64: 8, 256>}]} {
    %c0 = arith.constant 0 : index
    %c0_0 = arith.constant 0 : index
    %0 = vector.load %arg1[%c0, %c0_0] : memref<8x32xf32, #tpu.memory_space<vmem>>, vector<8x32xf32>
    %c0_1 = arith.constant 0 : index
    %c0_2 = arith.constant 0 : index
    %1 = vector.load %arg2[%c0_1, %c0_2] : memref<32x256xf32, #tpu.memory_space<vmem>>, vector<32x256xf32>
    %cst = arith.constant dense<0.000000e+00> : vector<8x256xf32>
    %2 = tpu.matmul %0, %1, %cst {dimension_numbers = #tpu.dot_dimension_numbers<[1], [0], [0], [1], [0, 0, 1, 1], [], []>} : vector<8x32xf32>, vector<32x256xf32>, vector<8x256xf32> -> vector<8x256xf32>
    %c0_3 = arith.constant 0 : index
    %c0_4 = arith.constant 0 : index
    %3 = vector.load %arg3[%c0_3, %c0_4] : memref<1x256xf32, #tpu.memory_space<vmem>>, vector<1x256xf32>
    %4 = vector.broadcast %3 : vector<1x256xf32> to vector<8x256xf32>
    %5 = arith.addf %2, %4 : vector<8x256xf32>
    %cst_5 = arith.constant 0.000000e+00 : f32
    %6 = vector.broadcast %cst_5 : f32 to vector<8x256xf32>
    %7 = arith.maximumf %5, %6 : vector<8x256xf32>
    %c0_6 = arith.constant 0 : index
    %c0_7 = arith.constant 0 : index
    %8 = vector.load %arg4[%c0_6, %c0_7] : memref<256x256xf32, #tpu.memory_space<vmem>>, vector<256x256xf32>
    %cst_8 = arith.constant dense<0.000000e+00> : vector<8x256xf32>
    %9 = tpu.matmul %7, %8, %cst_8 {dimension_numbers = #tpu.dot_dimension_numbers<[1], [0], [0], [1], [0, 0, 1, 1], [], []>} : vector<8x256xf32>, vector<256x256xf32>, vector<8x256xf32> -> vector<8x256xf32>
    %c0_9 = arith.constant 0 : index
    %c0_10 = arith.constant 0 : index
    %10 = vector.load %arg5[%c0_9, %c0_10] : memref<1x256xf32, #tpu.memory_space<vmem>>, vector<1x256xf32>
    %11 = vector.broadcast %10 : vector<1x256xf32> to vector<8x256xf32>
    %12 = arith.addf %9, %11 : vector<8x256xf32>
    %cst_11 = arith.constant 0.000000e+00 : f32
    %13 = vector.broadcast %cst_11 : f32 to vector<8x256xf32>
    %14 = arith.maximumf %12, %13 : vector<8x256xf32>
    %c0_12 = arith.constant 0 : index
    %c0_13 = arith.constant 0 : index
    %15 = vector.load %arg6[%c0_12, %c0_13] : memref<256x256xf32, #tpu.memory_space<vmem>>, vector<256x256xf32>
    %cst_14 = arith.constant dense<0.000000e+00> : vector<8x256xf32>
    %16 = tpu.matmul %14, %15, %cst_14 {dimension_numbers = #tpu.dot_dimension_numbers<[1], [0], [0], [1], [0, 0, 1, 1], [], []>} : vector<8x256xf32>, vector<256x256xf32>, vector<8x256xf32> -> vector<8x256xf32>
    %c0_15 = arith.constant 0 : index
    %c0_16 = arith.constant 0 : index
    %17 = vector.load %arg7[%c0_15, %c0_16] : memref<1x256xf32, #tpu.memory_space<vmem>>, vector<1x256xf32>
    %18 = vector.broadcast %17 : vector<1x256xf32> to vector<8x256xf32>
    %19 = arith.addf %16, %18 : vector<8x256xf32>
    %cst_17 = arith.constant dense<0xFF800000> : vector<8xf32>
    %20 = vector.multi_reduction <maximumf>, %19, %cst_17 [1] : vector<8x256xf32> to vector<8xf32>
    %21 = vector.shape_cast %20 : vector<8xf32> to vector<8x1xf32>
    %22 = vector.broadcast %21 : vector<8x1xf32> to vector<8x256xf32>
    %23 = arith.subf %19, %22 : vector<8x256xf32>
    %24 = math.exp %23 : vector<8x256xf32>
    %cst_18 = arith.constant dense<0.000000e+00> : vector<8xf32>
    %25 = vector.multi_reduction <add>, %24, %cst_18 [1] : vector<8x256xf32> to vector<8xf32>
    %26 = vector.shape_cast %25 : vector<8xf32> to vector<8x1xf32>
    %27 = math.log %26 : vector<8x1xf32>
    %28 = vector.broadcast %27 : vector<8x1xf32> to vector<8x256xf32>
    %29 = arith.subf %23, %28 : vector<8x256xf32>
    %c0_19 = arith.constant 0 : index
    %c0_20 = arith.constant 0 : index
    %30 = vector.load %arg8[%c0_19, %c0_20] : memref<8x256xf32, #tpu.memory_space<vmem>>, vector<8x256xf32>
    tpu.vector_store %arg8[%c0_19, %c0_20], %29 {strides = array<i32>} : memref<8x256xf32, #tpu.memory_space<vmem>>, vector<8x256xf32>,
    return
  }
  func.func @transform_0(%arg0: i32) -> (i32, i32) {
    %c0_i32 = arith.constant 0 : i32
    %c0_i32_0 = arith.constant 0 : i32
    return %arg0, %c0_i32 : i32, i32
  }
  func.func @transform_1(%arg0: i32) -> (i32, i32) {
    %c0_i32 = arith.constant 0 : i32
    %c0_i32_0 = arith.constant 0 : i32
    %c0_i32_1 = arith.constant 0 : i32
    return %c0_i32, %c0_i32_0 : i32, i32
  }
  func.func @transform_2(%arg0: i32) -> (i32, i32) {
    %c0_i32 = arith.constant 0 : i32
    %c0_i32_0 = arith.constant 0 : i32
    %c0_i32_1 = arith.constant 0 : i32
    return %c0_i32, %c0_i32_0 : i32, i32
  }
  func.func @transform_3(%arg0: i32) -> (i32, i32) {
    %c0_i32 = arith.constant 0 : i32
    %c0_i32_0 = arith.constant 0 : i32
    %c0_i32_1 = arith.constant 0 : i32
    return %c0_i32, %c0_i32_0 : i32, i32
  }
  func.func @transform_4(%arg0: i32) -> (i32, i32) {
    %c0_i32 = arith.constant 0 : i32
    %c0_i32_0 = arith.constant 0 : i32
    %c0_i32_1 = arith.constant 0 : i32
    return %c0_i32, %c0_i32_0 : i32, i32
  }
  func.func @transform_5(%arg0: i32) -> (i32, i32) {
    %c0_i32 = arith.constant 0 : i32
    %c0_i32_0 = arith.constant 0 : i32
    %c0_i32_1 = arith.constant 0 : i32
    return %c0_i32, %c0_i32_0 : i32, i32
  }
  func.func @transform_6(%arg0: i32) -> (i32, i32) {
    %c0_i32 = arith.constant 0 : i32
    %c0_i32_0 = arith.constant 0 : i32
    %c0_i32_1 = arith.constant 0 : i32
    return %c0_i32, %c0_i32_0 : i32, i32
  }
  func.func @transform_7(%arg0: i32) -> (i32, i32) {
    %c0_i32 = arith.constant 0 : i32
    %c0_i32_0 = arith.constant 0 : i32
    return %arg0, %c0_i32 : i32, i32
  }
}

</mosaic_0001>

<bundles_post_ra>
// kernel: tpu_custom_call.1
= control target key start
LH: loop header
LB: loop body
LE: loop exit
PB: predicated region body
PF: predicated region fallthrough
CT: control target
= control target key end

     0   :  { %12 = vsyncpa [#allocation3], 0  ;;  %s713_s0 = inlined_call_operand.hbm [shape: f32[8,32], index: 0, kind: input, shape index: {}]   ;;  %s714_s1 = inlined_call_operand.hbm [shape: f32[32,256], index: 1, kind: input, shape index: {}]   ;;  %s715_s2 = inlined_call_operand.vmem [shape: f32[1,256], index: 2, kind: input, shape index: {}]   ;;  %s716_s3 = inlined_call_operand.hbm [shape: f32[256,256], index: 3, kind: input, shape index: {}]   ;;  %s717_s4 = inlined_call_operand.vmem [shape: f32[1,256], index: 4, kind: input, shape index: {}]   ;;  %s718_s5 = inlined_call_operand.hbm [shape: f32[256,256], index: 5, kind: input, shape index: {}]   ;;  %s719_s6 = inlined_call_operand.vmem [shape: f32[1,256], index: 6, kind: input, shape index: {}]   ;;  %s720_s7 = inlined_call_operand.hbm [shape: f32[8,256], index: 7, kind: output, shape index: {}]  }
   0x1   :  { %13 = vsyncpa [#allocation6], 0 }
   0x2   :  { %14 = vsyncpa [#allocation9], 0 }
   0x3   :  { %15 = vsyncpa [#allocation4], 0  ;;  %s632_s24 = smov [#allocation5]  }
   0x4   :  { %s31_s25 = sshll.u32 %s632_s24, 4  ;;  %s32_s25 = int_to_ptr.vmem [resolvable:$true] %s31_s25 }
   0x5   :  { %s532_s26 = scalar_lea.vmem %s32_s25, 1024  ;;  %p537_p1 = scmp.lt.s32.totalorder %s32_s25, %s32_s25 }
   0x6   :  { %p533_p0 = scmp.ne.s32.totalorder %s32_s25, %s532_s26  ;;  %p538_p2 = scmp.lt.s32.totalorder %s532_s26, %s532_s26 }
   0x8   :  { %p539_p3 = por %p538_p2, %p537_p1 }
   0xa   :  { %p540_p4 = pnand %p539_p3, %p533_p0 }
   0xc   :  { %543 = shalt.err (!%p540_p4)
}
   0xd   :  { %s633_s27 = smov 256   ;;  %s634_s28 = smov 16  }
   0xe   :  { %37 = dma.hbm_to_vmem [thread:$0]  %s714_s1, 1024, %s32_s25, [#allocation6], %s633_s27, %s633_s27, %s634_s28  }
   0xf   :  { %s635_s8 = smov [#allocation2]   ;;  %s636_s10 = smov [#allocation7]  }
  0x10   :  { %s22_s9 = sshll.u32 %s635_s8, 4  ;;  %s45_s11 = sshll.u32 %s636_s10, 4  ;;  %s23_s9 = int_to_ptr.vmem [resolvable:$true] %s22_s9  ;;  %s46_s11 = int_to_ptr.vmem [resolvable:$true] %s45_s11 }
  0x11   :  { %s552_s12 = scalar_lea.vmem %s23_s9, 128  ;;  %p557_p6 = scmp.lt.s32.totalorder %s23_s9, %s23_s9 }
  0x12   :  { %p553_p5 = scmp.ne.s32.totalorder %s23_s9, %s552_s12  ;;  %p558_p7 = scmp.lt.s32.totalorder %s552_s12, %s552_s12 }
  0x14   :  { %p559_p8 = por %p558_p7, %p557_p6 }
  0x16   :  { %p560_p9 = pnand %p559_p8, %p553_p5 }
  0x18   :  { %563 = shalt.err (!%p560_p9)
}
  0x19   :  { %25 = dma.hbm_to_vmem [thread:$0]  %s713_s0, 128, %s23_s9, [#allocation3]  }
  0x1a   :  { %s572_s15 = scalar_lea.vmem %s46_s11, 8192  ;;  %p577_p11 = scmp.lt.s32.totalorder %s46_s11, %s46_s11 }
  0x1b   :  { %p573_p10 = scmp.ne.s32.totalorder %s46_s11, %s572_s15  ;;  %p578_p12 = scmp.lt.s32.totalorder %s572_s15, %s572_s15 }
  0x1d   :  { %p579_p13 = por %p578_p12, %p577_p11 }
  0x1f   :  { %p580_p0 = pnand %p579_p13, %p573_p10 }
  0x21   :  { %583 = shalt.err (!%p580_p0)
}
  0x22   :  { %51 = dma.hbm_to_vmem [thread:$0]  %s716_s3, 8192, %s46_s11, [#allocation6], %s633_s27, %s633_s27, %s634_s28  }
  0x23   :  { %s637_s17 = smov [#allocation8]  }
  0x24   :  { %s59_s18 = sshll.u32 %s637_s17, 4  ;;  %s60_s18 = int_to_ptr.vmem [resolvable:$true] %s59_s18 }
  0x25   :  { %s592_s19 = scalar_lea.vmem %s60_s18, 8192  ;;  %p597_p2 = scmp.lt.s32.totalorder %s60_s18, %s60_s18 }
  0x26   :  { %p593_p1 = scmp.ne.s32.totalorder %s60_s18, %s592_s19  ;;  %p598_p3 = scmp.lt.s32.totalorder %s592_s19, %s592_s19 }
  0x28   :  { %p599_p4 = por %p598_p3, %p597_p2 }
  0x2a   :  { %p600_p5 = pnand %p599_p4, %p593_p1 }
  0x2c   :  { %603 = shalt.err (!%p600_p5)
}
  0x2d   :  { %65 = dma.hbm_to_vmem [thread:$0]  %s718_s5, 8192, %s60_s18, [#allocation9], %s633_s27, %s633_s27, %s634_s28  }
  0x2e   :  { %624 = dma.done.wait [#allocation3], 128  }
  0x2f   :  { %625 = vsyncadd [#allocation3], 4294967168 }
  0x30   :  { %626 = dma.done.wait [#allocation6], 9216  }
  0x31   :  { %627 = vsyncadd [#allocation6], 4294958080 }
  0x32   :  { %628 = dma.done.wait [#allocation9], 8192  }
  0x33   :  { %629 = vsyncadd [#allocation9], 4294959104  ;;  %v638_v0 = vmov 0.0   ;;  %v88_v1 = vld [vmem:[#allocation5 + $0x38] sm:$0xff]  ;;  %v87_v2 = vld [vmem:[#allocation5 + $0x30] sm:$0xff]  ;;  %vm101_vm0 = vcmask 261120  }
  0x34   :  { %169 = vmatprep.mubr.f32.mxu0 %v638_v0  ;;  %v86_v3 = vld [vmem:[#allocation5 + $0x28] sm:$0xff]  ;;  %129 = vmatprep.subr.mxu0 %v88_v1  ;;  %v85_v4 = vld [vmem:[#allocation5 + $0x20] sm:$0xff]  ;;  %v84_v5 = vld [vmem:[#allocation5 + $0x18] sm:$0xff] }
  0x35   :  { %130 = vmatpush1.msra.mxu0 %v87_v2  ;;  %v83_v6 = vld [vmem:[#allocation5 + $0x10] sm:$0xff]  ;;  %v209_v7 = vld [vmem:[#allocation7 + $0xf8] sm:$0xff]  ;;  %v207_v9 = vld [vmem:[#allocation7 + $0xe8] sm:$0xff] }
  0x36   :  { %131 = vmatprep.subr.mxu0 %v86_v3  ;;  %v208_v8 = vld [vmem:[#allocation7 + $0xf0] sm:$0xff]  ;;  %v82_v10 = vld [vmem:[#allocation5 + $0x8] sm:$0xff]  ;;  %254 = vmatprep.subr.mxu1 %v209_v7  ;;  %v206_v11 = vld [vmem:[#allocation7 + $0xe0] sm:$0xff] }
  0x37   :  { %132 = vmatpush1.msra.mxu0 %v85_v4  ;;  %v81_v12 = vld [vmem:[#allocation5] sm:$0xff]  ;;  %255 = vmatpush1.msra.mxu1 %v208_v8  ;;  %v205_v13 = vld [vmem:[#allocation7 + $0xd8] sm:$0xff]  ;;  %v204_v15 = vld [vmem:[#allocation7 + $0xd0] sm:$0xff] }
  0x38   :  { %133 = vmatprep.subr.mxu0 %v84_v5  ;;  %v80_v14 = vld [vmem:[#allocation2] sm:$0xff]  ;;  %256 = vmatprep.subr.mxu1 %v207_v9  ;;  %v203_v16 = vld [vmem:[#allocation7 + $0xc8] sm:$0xff]  ;;  %v202_v17 = vld [vmem:[#allocation7 + $0xc0] sm:$0xff] }
  0x39   :  { %134 = vmatpush1.msra.mxu0 %v83_v6  ;;  %257 = vmatpush1.msra.mxu1 %v206_v11  ;;  %v201_v18 = vld [vmem:[#allocation7 + $0xb8] sm:$0xff]  ;;  %v200_v19 = vld [vmem:[#allocation7 + $0xb0] sm:$0xff]  ;;  %v199_v20 = vld [vmem:[#allocation7 + $0xa8] sm:$0xff] }
  0x3a   :  { %135 = vmatprep.subr.mxu0 %v82_v10  ;;  %258 = vmatprep.subr.mxu1 %v205_v13  ;;  %v198_v21 = vld [vmem:[#allocation7 + $0xa0] sm:$0xff]  ;;  %v197_v22 = vld [vmem:[#allocation7 + $0x98] sm:$0xff]  ;;  %v196_v23 = vld [vmem:[#allocation7 + $0x90] sm:$0xff] }
  0x3b   :  { %136 = vmatpush1.msra.mxu0 %v81_v12  ;;  %259 = vmatpush1.msra.mxu1 %v204_v15  ;;  %v195_v24 = vld [vmem:[#allocation7 + $0x88] sm:$0xff]  ;;  %v194_v25 = vld [vmem:[#allocation7 + $0x80] sm:$0xff]  ;;  %v193_v26 = vld [vmem:[#allocation7 + $0x78] sm:$0xff] }
  0x3c   :  { %509 = vmatmul.mubr.msk.f32.vlgmr.msra.gmra.mxu0 %vm101_vm0, %v80_v14  ;;  %260 = vmatprep.subr.mxu1 %v203_v16  ;;  %v192_v27 = vld [vmem:[#allocation7 + $0x70] sm:$0xff]  ;;  %v191_v28 = vld [vmem:[#allocation7 + $0x68] sm:$0xff]  ;;  %v190_v29 = vld [vmem:[#allocation7 + $0x60] sm:$0xff] }
  0x3d   :  { %261 = vmatpush1.msra.mxu1 %v202_v17  ;;  %v189_v30 = vld [vmem:[#allocation7 + $0x58] sm:$0xff]  ;;  %v188_v31 = vld [vmem:[#allocation7 + $0x50] sm:$0xff]  ;;  %v187_v32 = vld [vmem:[#allocation7 + $0x48] sm:$0xff] }
  0x3e   :  { %262 = vmatprep.subr.mxu1 %v201_v18  ;;  %v186_v33 = vld [vmem:[#allocation7 + $0x40] sm:$0xff]  ;;  %v185_v34 = vld [vmem:[#allocation7 + $0x38] sm:$0xff]  ;;  %v184_v35 = vld [vmem:[#allocation7 + $0x30] sm:$0xff] }
  0x3f   :  { %263 = vmatpush1.msra.mxu1 %v200_v19  ;;  %v183_v36 = vld [vmem:[#allocation7 + $0x28] sm:$0xff]  ;;  %v182_v37 = vld [vmem:[#allocation7 + $0x20] sm:$0xff]  ;;  %v181_v38 = vld [vmem:[#allocation7 + $0x18] sm:$0xff] }
  0x40   :  { %264 = vmatprep.subr.mxu1 %v199_v20  ;;  %v180_v39 = vld [vmem:[#allocation7 + $0x10] sm:$0xff]  ;;  %v179_v40 = vld [vmem:[#allocation7 + $0x8] sm:$0xff]  ;;  %v178_v41 = vld [vmem:[#allocation7] sm:$0xff] }
  0x41   :  { %265 = vmatpush1.msra.mxu1 %v198_v21  ;;  %v241_v42 = vld [vmem:[#allocation7 + $0x1f8] sm:$0xff]  ;;  %v240_v43 = vld [vmem:[#allocation7 + $0x1f0] sm:$0xff]  ;;  %v239_v44 = vld [vmem:[#allocation7 + $0x1e8] sm:$0xff] }
  0x42   :  { %266 = vmatprep.subr.mxu1 %v197_v22  ;;  %v238_v45 = vld [vmem:[#allocation7 + $0x1e0] sm:$0xff]  ;;  %v237_v46 = vld [vmem:[#allocation7 + $0x1d8] sm:$0xff]  ;;  %v236_v47 = vld [vmem:[#allocation7 + $0x1d0] sm:$0xff] }
  0x43   :  { %267 = vmatpush1.msra.mxu1 %v196_v23  ;;  %v235_v48 = vld [vmem:[#allocation7 + $0x1c8] sm:$0xff]  ;;  %v234_v49 = vld [vmem:[#allocation7 + $0x1c0] sm:$0xff]  ;;  %v233_v50 = vld [vmem:[#allocation7 + $0x1b8] sm:$0xff] }
  0x44   :  { %268 = vmatprep.subr.mxu1 %v195_v24  ;;  %v232_v51 = vld [vmem:[#allocation7 + $0x1b0] sm:$0xff]  ;;  %v231_v52 = vld [vmem:[#allocation7 + $0x1a8] sm:$0xff]  ;;  %v230_v53 = vld [vmem:[#allocation7 + $0x1a0] sm:$0xff] }
  0x45   :  { %269 = vmatpush1.msra.mxu1 %v194_v25  ;;  %v229_v54 = vld [vmem:[#allocation7 + $0x198] sm:$0xff]  ;;  %v228_v55 = vld [vmem:[#allocation7 + $0x190] sm:$0xff]  ;;  %v227_v56 = vld [vmem:[#allocation7 + $0x188] sm:$0xff] }
  0x46   :  { %270 = vmatprep.subr.mxu1 %v193_v26  ;;  %v226_v57 = vld [vmem:[#allocation7 + $0x180] sm:$0xff]  ;;  %v225_v58 = vld [vmem:[#allocation7 + $0x178] sm:$0xff]  ;;  %v224_v59 = vld [vmem:[#allocation7 + $0x170] sm:$0xff] }
  0x47   :  { %271 = vmatpush1.msra.mxu1 %v192_v27  ;;  %v223_v60 = vld [vmem:[#allocation7 + $0x168] sm:$0xff]  ;;  %v222_v61 = vld [vmem:[#allocation7 + $0x160] sm:$0xff]  ;;  %v221_v62 = vld [vmem:[#allocation7 + $0x158] sm:$0xff] }
  0x48   :  { %272 = vmatprep.subr.mxu1 %v191_v28  ;;  %v220_v63 = vld [vmem:[#allocation7 + $0x150] sm:$0xff]  ;;  %v219_v0 = vld [vmem:[#allocation7 + $0x148] sm:$0xff]  ;;  %v218_v1 = vld [vmem:[#allocation7 + $0x140] sm:$0xff] }
  0x49   :  { %273 = vmatpush1.msra.mxu1 %v190_v29  ;;  %v217_v2 = vld [vmem:[#allocation7 + $0x138] sm:$0xff]  ;;  %v216_v3 = vld [vmem:[#allocation7 + $0x130] sm:$0xff]  ;;  %v215_v4 = vld [vmem:[#allocation7 + $0x128] sm:$0xff] }
  0x4a   :  { %274 = vmatprep.subr.mxu1 %v189_v30  ;;  %v214_v5 = vld [vmem:[#allocation7 + $0x120] sm:$0xff]  ;;  %v213_v6 = vld [vmem:[#allocation7 + $0x118] sm:$0xff]  ;;  %v212_v7 = vld [vmem:[#allocation7 + $0x110] sm:$0xff] }
  0x4b   :  { %275 = vmatpush1.msra.mxu1 %v188_v31  ;;  %v211_v8 = vld [vmem:[#allocation7 + $0x108] sm:$0xff]  ;;  %v210_v9 = vld [vmem:[#allocation7 + $0x100] sm:$0xff]  ;;  %v358_v10 = vld [vmem:[#allocation8 + $0xf8] sm:$0xff] }
  0x4c   :  { %276 = vmatprep.subr.mxu1 %v187_v32  ;;  %v357_v11 = vld [vmem:[#allocation8 + $0xf0] sm:$0xff]  ;;  %v356_v12 = vld [vmem:[#allocation8 + $0xe8] sm:$0xff]  ;;  %403 = vmatprep.subr.mxu0 %v358_v10  ;;  %v355_v13 = vld [vmem:[#allocation8 + $0xe0] sm:$0xff] }
  0x4d   :  { %277 = vmatpush1.msra.mxu1 %v186_v33  ;;  %404 = vmatpush1.msra.mxu0 %v357_v11  ;;  %v354_v14 = vld [vmem:[#allocation8 + $0xd8] sm:$0xff]  ;;  %v353_v15 = vld [vmem:[#allocation8 + $0xd0] sm:$0xff]  ;;  %v352_v16 = vld [vmem:[#allocation8 + $0xc8] sm:$0xff] }
  0x4e   :  { %278 = vmatprep.subr.mxu1 %v185_v34  ;;  %405 = vmatprep.subr.mxu0 %v356_v12  ;;  %v351_v17 = vld [vmem:[#allocation8 + $0xc0] sm:$0xff]  ;;  %v350_v18 = vld [vmem:[#allocation8 + $0xb8] sm:$0xff]  ;;  %v349_v19 = vld [vmem:[#allocation8 + $0xb0] sm:$0xff] }
  0x4f   :  { %279 = vmatpush1.msra.mxu1 %v184_v35  ;;  %406 = vmatpush1.msra.mxu0 %v355_v13  ;;  %v348_v20 = vld [vmem:[#allocation8 + $0xa8] sm:$0xff]  ;;  %v347_v21 = vld [vmem:[#allocation8 + $0xa0] sm:$0xff]  ;;  %v346_v22 = vld [vmem:[#allocation8 + $0x98] sm:$0xff] }
  0x50   :  { %280 = vmatprep.subr.mxu1 %v183_v36  ;;  %407 = vmatprep.subr.mxu0 %v354_v14  ;;  %v345_v23 = vld [vmem:[#allocation8 + $0x90] sm:$0xff]  ;;  %v344_v24 = vld [vmem:[#allocation8 + $0x88] sm:$0xff]  ;;  %v343_v25 = vld [vmem:[#allocation8 + $0x80] sm:$0xff] }
  0x51   :  { %281 = vmatpush1.msra.mxu1 %v182_v37  ;;  %408 = vmatpush1.msra.mxu0 %v353_v15  ;;  %v342_v26 = vld [vmem:[#allocation8 + $0x78] sm:$0xff]  ;;  %v341_v27 = vld [vmem:[#allocation8 + $0x70] sm:$0xff]  ;;  %v340_v28 = vld [vmem:[#allocation8 + $0x68] sm:$0xff] }
  0x52   :  { %282 = vmatprep.subr.mxu1 %v181_v38  ;;  %409 = vmatprep.subr.mxu0 %v352_v16  ;;  %v339_v29 = vld [vmem:[#allocation8 + $0x60] sm:$0xff]  ;;  %v338_v30 = vld [vmem:[#allocation8 + $0x58] sm:$0xff]  ;;  %v337_v31 = vld [vmem:[#allocation8 + $0x50] sm:$0xff] }
  0x53   :  { %283 = vmatpush1.msra.mxu1 %v180_v39  ;;  %410 = vmatpush1.msra.mxu0 %v351_v17  ;;  %v336_v32 = vld [vmem:[#allocation8 + $0x48] sm:$0xff]  ;;  %v335_v33 = vld [vmem:[#allocation8 + $0x40] sm:$0xff]  ;;  %v334_v34 = vld [vmem:[#allocation8 + $0x38] sm:$0xff] }
  0x54   :  { %284 = vmatprep.subr.mxu1 %v179_v40  ;;  %411 = vmatprep.subr.mxu0 %v350_v18  ;;  %v333_v35 = vld [vmem:[#allocation8 + $0x30] sm:$0xff]  ;;  %v332_v36 = vld [vmem:[#allocation8 + $0x28] sm:$0xff]  ;;  %v331_v37 = vld [vmem:[#allocation8 + $0x20] sm:$0xff] }
  0x55   :  { %285 = vmatpush1.msra.mxu1 %v178_v41  ;;  %412 = vmatpush1.msra.mxu0 %v349_v19  ;;  %v330_v38 = vld [vmem:[#allocation8 + $0x18] sm:$0xff]  ;;  %v329_v39 = vld [vmem:[#allocation8 + $0x10] sm:$0xff]  ;;  %v328_v40 = vld [vmem:[#allocation8 + $0x8] sm:$0xff] }
  0x56   :  { %286 = vmatprep.subr.mxu1 %v241_v42  ;;  %413 = vmatprep.subr.mxu0 %v348_v20  ;;  %v327_v41 = vld [vmem:[#allocation8] sm:$0xff]  ;;  %v390_v42 = vld [vmem:[#allocation8 + $0x1f8] sm:$0xff]  ;;  %v365_v16 = vld [vmem:[#allocation8 + $0x130] sm:$0xff] }
  0x57   :  { %287 = vmatpush2.msra.mxu1 %v240_v43  ;;  %414 = vmatpush1.msra.mxu0 %v347_v21  ;;  %v389_v43 = vld [vmem:[#allocation8 + $0x1f0] sm:$0xff]  ;;  %v366_v15 = vld [vmem:[#allocation8 + $0x138] sm:$0xff]  ;;  %v364_v17 = vld [vmem:[#allocation8 + $0x128] sm:$0xff] }
  0x58   :  { %288 = vmatprep.subr.mxu1 %v239_v44  ;;  %415 = vmatprep.subr.mxu0 %v346_v22  ;;  %v388_v44 = vld [vmem:[#allocation8 + $0x1e8] sm:$0xff]  ;;  %v363_v18 = vld [vmem:[#allocation8 + $0x120] sm:$0xff]  ;;  %v362_v19 = vld [vmem:[#allocation8 + $0x118] sm:$0xff] }
  0x59   :  { %289 = vmatpush2.msra.mxu1 %v238_v45  ;;  %416 = vmatpush1.msra.mxu0 %v345_v23  ;;  %v387_v45 = vld [vmem:[#allocation8 + $0x1e0] sm:$0xff]  ;;  %v361_v20 = vld [vmem:[#allocation8 + $0x110] sm:$0xff]  ;;  %v360_v21 = vld [vmem:[#allocation8 + $0x108] sm:$0xff] }
  0x5a   :  { %290 = vmatprep.subr.mxu1 %v237_v46  ;;  %417 = vmatprep.subr.mxu0 %v344_v24  ;;  %v386_v46 = vld [vmem:[#allocation8 + $0x1d8] sm:$0xff]  ;;  %v359_v22 = vld [vmem:[#allocation8 + $0x100] sm:$0xff] }
  0x5b   :  { %291 = vmatpush2.msra.mxu1 %v236_v47  ;;  %418 = vmatpush1.msra.mxu0 %v343_v25  ;;  %v385_v47 = vld [vmem:[#allocation8 + $0x1d0] sm:$0xff]  ;;  %v242_v23 = vld [vmem:[%s717_s4] sm:$0x3]  ;;  %s639_s4 = smov [#allocation10]  }
  0x5c   :  { %292 = vmatprep.subr.mxu1 %v235_v48  ;;  %419 = vmatprep.subr.mxu0 %v342_v26  ;;  %v384_v48 = vld [vmem:[#allocation8 + $0x1c8] sm:$0xff] }
  0x5d   :  { %293 = vmatpush2.msra.mxu1 %v234_v49  ;;  %420 = vmatpush1.msra.mxu0 %v341_v27  ;;  %v383_v49 = vld [vmem:[#allocation8 + $0x1c0] sm:$0xff] }
  0x5e   :  { %294 = vmatprep.subr.mxu1 %v233_v50  ;;  %421 = vmatprep.subr.mxu0 %v340_v28  ;;  %v382_v50 = vld [vmem:[#allocation8 + $0x1b8] sm:$0xff] }
  0x5f   :  { %295 = vmatpush2.msra.mxu1 %v232_v51  ;;  %422 = vmatpush1.msra.mxu0 %v339_v29  ;;  %v381_v51 = vld [vmem:[#allocation8 + $0x1b0] sm:$0xff] }
  0x60   :  { %296 = vmatprep.subr.mxu1 %v231_v52  ;;  %423 = vmatprep.subr.mxu0 %v338_v30  ;;  %v380_v52 = vld [vmem:[#allocation8 + $0x1a8] sm:$0xff] }
  0x61   :  { %297 = vmatpush2.msra.mxu1 %v230_v53  ;;  %424 = vmatpush1.msra.mxu0 %v337_v31  ;;  %v379_v53 = vld [vmem:[#allocation8 + $0x1a0] sm:$0xff] }
  0x62   :  { %298 = vmatprep.subr.mxu1 %v229_v54  ;;  %425 = vmatprep.subr.mxu0 %v336_v32  ;;  %v378_v54 = vld [vmem:[#allocation8 + $0x198] sm:$0xff] }
  0x63   :  { %299 = vmatpush2.msra.mxu1 %v228_v55  ;;  %426 = vmatpush1.msra.mxu0 %v335_v33  ;;  %v377_v55 = vld [vmem:[#allocation8 + $0x190] sm:$0xff]  ;;  %v391_v32 = vld [vmem:[%s719_s6] sm:$0x3]  ;;  %s498_s6 = sshll.u32 %s639_s4, 4  ;;  %s499_s6 = int_to_ptr.vmem [resolvable:$true] %s498_s6 }
  0x64   :  { %300 = vmatprep.subr.mxu1 %v227_v56  ;;  %427 = vmatprep.subr.mxu0 %v334_v34  ;;  %v376_v56 = vld [vmem:[#allocation8 + $0x188] sm:$0xff]  ;;  %s604_s24 = scalar_lea.vmem %s499_s6, 256  ;;  %p609_p7 = scmp.lt.s32.totalorder %s499_s6, %s499_s6 }
  0x65   :  { %301 = vmatpush2.msra.mxu1 %v226_v57  ;;  %428 = vmatpush1.msra.mxu0 %v333_v35  ;;  %v375_v57 = vld [vmem:[#allocation8 + $0x180] sm:$0xff]  ;;  %p605_p6 = scmp.ne.s32.totalorder %s499_s6, %s604_s24  ;;  %p610_p8 = scmp.lt.s32.totalorder %s604_s24, %s604_s24 }
  0x66   :  { %302 = vmatprep.subr.mxu1 %v225_v58  ;;  %429 = vmatprep.subr.mxu0 %v332_v36  ;;  %v374_v58 = vld [vmem:[#allocation8 + $0x178] sm:$0xff] }
  0x67   :  { %303 = vmatpush2.msra.mxu1 %v224_v59  ;;  %430 = vmatpush1.msra.mxu0 %v331_v37  ;;  %v373_v59 = vld [vmem:[#allocation8 + $0x170] sm:$0xff]  ;;  %p611_p9 = por %p610_p8, %p609_p7 }
  0x68   :  { %304 = vmatprep.subr.mxu1 %v223_v60  ;;  %431 = vmatprep.subr.mxu0 %v330_v38  ;;  %v372_v60 = vld [vmem:[#allocation8 + $0x168] sm:$0xff] }
  0x69   :  { %305 = vmatpush2.msra.mxu1 %v222_v61  ;;  %432 = vmatpush1.msra.mxu0 %v329_v39  ;;  %v371_v61 = vld [vmem:[#allocation8 + $0x160] sm:$0xff]  ;;  %p612_p10 = pnand %p611_p9, %p605_p6 }
  0x6a   :  { %306 = vmatprep.subr.mxu1 %v221_v62  ;;  %433 = vmatprep.subr.mxu0 %v328_v40  ;;  %v370_v62 = vld [vmem:[#allocation8 + $0x158] sm:$0xff] }
  0x6b   :  { %307 = vmatpush2.msra.mxu1 %v220_v63  ;;  %434 = vmatpush1.msra.mxu0 %v327_v41  ;;  %v369_v63 = vld [vmem:[#allocation8 + $0x150] sm:$0xff] }
  0x6c   :  { %308 = vmatprep.subr.mxu1 %v219_v0  ;;  %435 = vmatprep.subr.mxu0 %v390_v42  ;;  %v368_v0 = vld [vmem:[#allocation8 + $0x148] sm:$0xff] }
  0x6d   :  { %309 = vmatpush2.msra.mxu1 %v218_v1  ;;  %436 = vmatpush2.msra.mxu0 %v389_v43  ;;  %v367_v1 = vld [vmem:[#allocation8 + $0x140] sm:$0xff] }
  0x6e   :  { %310 = vmatprep.subr.mxu1 %v217_v2  ;;  %437 = vmatprep.subr.mxu0 %v388_v44  ;;  %v91_v2 = vlaneseq }
  0x6f   :  { %311 = vmatpush2.msra.mxu1 %v216_v3  ;;  %438 = vmatpush2.msra.mxu0 %v387_v45 }
  0x70   :  { %312 = vmatprep.subr.mxu1 %v215_v4  ;;  %439 = vmatprep.subr.mxu0 %v386_v46  ;;  %v92_v3 = vshrl.u32 %v91_v2, 7 }
  0x71   :  { %313 = vmatpush2.msra.mxu1 %v214_v5  ;;  %440 = vmatpush2.msra.mxu0 %v385_v47  ;;  %v89_v5 = vld [vmem:[%s715_s2] sm:$0x3] }
  0x72   :  { %314 = vmatprep.subr.mxu1 %v213_v6  ;;  %441 = vmatprep.subr.mxu0 %v384_v48  ;;  %v93_v4 = vsub.s32 0, %v92_v3  ;;  %v97_v6 = vsub.s32 1, %v92_v3 }
  0x73   :  { %315 = vmatpush2.msra.mxu1 %v212_v7  ;;  %442 = vmatpush2.msra.mxu0 %v383_v49 }
  0x74   :  { %316 = vmatprep.subr.mxu1 %v211_v8  ;;  %443 = vmatprep.subr.mxu0 %v382_v50  ;;  %v94_v7 = vrot.slane %v89_v5, %v93_v4  ;;  %v98_v8 = vrot.slane %v89_v5, %v97_v6  ;;  %v247_v24 = vrot.slane %v242_v23, %v93_v4 }
  0x75   :  { %317 = vmatpush2.msra.mxu1 %v210_v9  ;;  %444 = vmatpush2.msra.mxu0 %v381_v51  ;;  %v251_v25 = vrot.slane %v242_v23, %v97_v6  ;;  %v396_v33 = vrot.slane %v391_v32, %v93_v4  ;;  %v400_v34 = vrot.slane %v391_v32, %v97_v6 }
  0x76   :  { %445 = vmatprep.subr.mxu0 %v380_v52 }
  0x77   :  { %446 = vmatpush2.msra.mxu0 %v379_v53 }
  0x78   :  { %447 = vmatprep.subr.mxu0 %v378_v54 }
  0x79   :  { %448 = vmatpush2.msra.mxu0 %v377_v55 }
  0x7a   :  { %449 = vmatprep.subr.mxu0 %v376_v56 }
  0x7b   :  { %450 = vmatpush2.msra.mxu0 %v375_v57 }
  0x7c   :  { %451 = vmatprep.subr.mxu0 %v374_v58 }
  0x7d   :  { %452 = vmatpush2.msra.mxu0 %v373_v59 }
  0x7e   :  { %453 = vmatprep.subr.mxu0 %v372_v60 }
  0x7f   :  { %454 = vmatpush2.msra.mxu0 %v371_v61 }
  0x80   :  { %455 = vmatprep.subr.mxu0 %v370_v62 }
  0x81   :  { %456 = vmatpush2.msra.mxu0 %v369_v63 }
  0x82   :  { %457 = vmatprep.subr.mxu0 %v368_v0 }
  0x83   :  { %458 = vmatpush2.msra.mxu0 %v367_v1 }
  0x84   :  { %459 = vmatprep.subr.mxu0 %v366_v15 }
  0x85   :  { %460 = vmatpush2.msra.mxu0 %v365_v16 }
  0x86   :  { %461 = vmatprep.subr.mxu0 %v364_v17 }
  0x87   :  { %462 = vmatpush2.msra.mxu0 %v363_v18 }
  0x88   :  { %463 = vmatprep.subr.mxu0 %v362_v19 }
  0x89   :  { %464 = vmatpush2.msra.mxu0 %v361_v20 }
  0x8a   :  { %465 = vmatprep.subr.mxu0 %v360_v21 }
  0x8b   :  { %466 = vmatpush2.msra.mxu0 %v359_v22 }
  0xfc   :  { %v171_v9 = vpop.f32.mrf.mxu0 }
  0xfd   :  { %v172_v10 = vadd.f32 %v171_v9, %v94_v7 }
  0xfe   :  { %v173_v11 = vpop.f32.mrf.mxu0 }
  0xff   :  { %v174_v12 = vadd.f32 %v173_v11, %v98_v8  ;;  %v176_v14 = vmax.f32 %v172_v10, 0.0 }
 0x101   :  { %v177_v13 = vmax.f32 %v174_v12, 0.0 }
 0x103   :  { %318 = vmatprep.mubr.f32.mxu1 %v177_v13 }
 0x104   :  { %319 = vmatmul.mubr.f32.vlgmr.msra.gmra.mxu1 %v176_v14 }
 0x1c4   :  { %v320_v26 = vpop.f32.mrf.mxu1 }
 0x1c5   :  { %v321_v27 = vadd.f32 %v320_v26, %v247_v24 }
 0x1c6   :  { %v322_v28 = vpop.f32.mrf.mxu1 }
 0x1c7   :  { %v323_v29 = vadd.f32 %v322_v28, %v251_v25  ;;  %v325_v31 = vmax.f32 %v321_v27, 0.0 }
 0x1c9   :  { %v326_v30 = vmax.f32 %v323_v29, 0.0 }
 0x1cb   :  { %467 = vmatprep.mubr.f32.mxu0 %v326_v30 }
 0x1cc   :  { %468 = vmatmul.mubr.f32.vlgmr.msra.gmra.mxu0 %v325_v31 }
 0x28c   :  { %v469_v35 = vpop.f32.mrf.mxu0 }
 0x28d   :  { %v470_v37 = vadd.f32 %v469_v35, %v396_v33 }
 0x28e   :  { %v471_v36 = vpop.f32.mrf.mxu0 }
 0x28f   :  { %v472_v38 = vadd.f32 %v471_v36, %v400_v34 }
 0x291   :  { %v474_v39 = vmax.f32 %v470_v37, %v472_v38 }
 0x293   :  { %475 = vmax.xlane.f32.xlu0 %v474_v39 }
 0x31c   :  { %v476_v40 = vpop.xlane.xlu0 %475 }
 0x31d   :  { %v477_v41 = vsub.f32 %v470_v37, %v476_v40  ;;  %v478_v42 = vsub.f32 %v472_v38, %v476_v40 }
 0x31f   :  { %v479_v43 = vmul.f32 1.442695, %v477_v41  ;;  %v481_v44 = vmul.f32 1.442695, %v478_v42 }
 0x321   :  { %518 = vpow2.f32 %v479_v43 }
 0x322   :  { %520 = vpow2.f32 %v481_v44 }
 0x32e   :  { %v519_v45 = vpop.eup %518 }
 0x32f   :  { %v521_v46 = vpop.eup %520 }
 0x330   :  { %v483_v47 = vadd.f32 %v521_v46, %v519_v45 }
 0x332   :  { %484 = vadd.xlane.f32.xlu0 %v483_v47 }
 0x3bb   :  { %v485_v48 = vpop.xlane.xlu0 %484 }
 0x3bc   :  { %522 = vlog2.f32 %v485_v48 }
 0x3c9   :  { %v523_v49 = vpop.eup %522 }
 0x3ca   :  { %v487_v50 = vmul.f32 0.6931472, %v523_v49 }
 0x3cc   :  { %v488_v51 = vsub.f32 %v477_v41, %v487_v50  ;;  %v489_v52 = vsub.f32 %v478_v42, %v487_v50 }
 0x3ce   :  { %490 = vst [vmem:[#allocation10] sm:$0xff] %v488_v51  ;;  %491 = vst [vmem:[#allocation10 + $0x8] sm:$0xff] %v489_v52 }
 0x3cf   :  { %615 = shalt.err (!%p612_p10)
}
 0x3d0   :  { %501 = dma.vmem_to_hbm [thread:$0]  %s499_s6, 256, %s720_s7, [#allocation4]  }
 0x3d1   :  { %630 = dma.done.wait [#allocation4], 256  }
 0x3d2   :  { %631 = vsyncadd [#allocation4], 4294967040 }
 0x3d3   :  { %505 = vsyncpa [#allocation3], 1 }
 0x3d4   :  { %506 = vsyncpa [#allocation6], 1 }
 0x3d5   :  { %507 = vsyncpa [#allocation9], 1 }
 0x3d6   :  { %508 = vsyncpa [#allocation4], 1 }

</bundles_post_ra>
